<compile_context>
chip_gen: v7x
topology: tpu7x:2x2x1
jax: 0.10.0
libtpu: 0.0.40
codegen_flags: <defaults>
</compile_context>

<pallas_src>
import jax
import jax.numpy as jnp
from jax.experimental import pallas as pl
from jax.experimental.pallas import tpu as pltpu


# ----------------------------------------------------------------------------
# Kernel
# ----------------------------------------------------------------------------
def _swiglu_kernel(x_ref, w_ref, b_ref, o_ref, acc1_ref, acc2_ref):
    """One (tm, tn) output tile, accumulated over the K (input-feature) axis.

    x_ref    : VMEM (tm, tk)      activations (compute dtype)
    w_ref    : VMEM (tk, 2*tn)    fused [W1_tile | beta*W2_tile]
    b_ref    : VMEM (1, 2*tn)     fused [b1_tile | beta*b2_tile] (f32)
    o_ref    : VMEM (tm, tn)      output tile
    acc1/2   : VMEM (tm, tn) f32  running partial sums for h1 / h2
    """
    k = pl.program_id(2)
    tn = o_ref.shape[-1]

    @pl.when(k == 0)
    def _init():
        acc1_ref[...] = jnp.zeros_like(acc1_ref)
        acc2_ref[...] = jnp.zeros_like(acc2_ref)

    x = x_ref[...]
    # Static Ref slices at 128-lane boundaries are free; two (tm, tn) dots
    # instead of one (tm, 2tn) dot keep the f32 intermediates half-sized.
    acc2_ref[...] += jnp.dot(x, w_ref[:, tn:], preferred_element_type=jnp.float32)
    acc1_ref[...] += jnp.dot(x, w_ref[:, :tn], preferred_element_type=jnp.float32)

    @pl.when(k == pl.num_programs(2) - 1)
    def _finalize():
        h2 = acc2_ref[...] + b_ref[:, tn:]       # beta already folded into W2/b2
        gate = jax.nn.sigmoid(h2)                # EUP
        h1 = acc1_ref[...] + b_ref[:, :tn]
        o_ref[...] = (h1 * gate).astype(o_ref.dtype)


# ----------------------------------------------------------------------------
# Host-side helpers
# ----------------------------------------------------------------------------
def _device_kind():
    try:
        return jax.devices()[0].device_kind.lower()
    except Exception:
        return ""


def _vmem_cap_bytes(kind):
    # v7x has 64 MiB VMEM per TensorCore -> stay under 48 MiB.
    # 128 MiB parts (v4/v5e/v5p/v6e) can take ~100 MiB of scoped VMEM.
    if "v7" in kind:
        return 48 * 1024 * 1024
    return 100 * 1024 * 1024


def _auto_tn(F):
    for cand in (256, 128):
        if F % cand == 0:
            return cand
    return F  # full-width fallback for small / odd feature counts


def prepare_swiglu_params(w1, b1, w2, b2, beta, *, tn=None,
                          compute_dtype=jnp.bfloat16):
    """Fuse / pre-cast SwiGLU parameters ONCE (not per forward call).

    w1, w2 : (F, F) pre-transposed so y = x @ w   (== nn.Linear weight.T)
    b1, b2 : (F,)
    beta   : scalar (nn.Parameter(torch.ones(1))) — folded into W2 / b2.
    """
    F = w1.shape[0]
    assert w1.shape == (F, F) and w2.shape == (F, F)
    assert b1.shape == (F,) and b2.shape == (F,)
    if tn is None:
        tn = _auto_tn(F)
    assert F % tn == 0, "in_features must be divisible by tn"
    assert tn % 128 == 0 or tn == F, "tn must be lane-aligned (multiple of 128)"
    n_tiles = F // tn

    beta = jnp.asarray(beta, jnp.float32).reshape(())
    w2b = w2.astype(jnp.float32) * beta
    b2b = b2.astype(jnp.float32) * beta

    # Interleave per N-tile so fused tile j = [W1_j | beta*W2_j] (contiguous).
    w_fused = jnp.concatenate(
        [w1.astype(jnp.float32).reshape(F, n_tiles, 1, tn),
         w2b.reshape(F, n_tiles, 1, tn)], axis=2
    ).reshape(F, 2 * F).astype(compute_dtype)
    b_fused = jnp.concatenate(
        [b1.astype(jnp.float32).reshape(n_tiles, 1, tn),
         b2b.reshape(n_tiles, 1, tn)], axis=1
    ).reshape(1, 2 * F).astype(jnp.float32)

    return dict(w_fused=w_fused, b_fused=b_fused, tn=tn,
                compute_dtype=compute_dtype, in_features=F)


def swiglu_apply(x, params, *, tm=None, _force_vmem_budget=None):
    """Apply SwiGLU with pre-fused parameters. x: (..., F)."""
    w_fused = params["w_fused"]
    b_fused = params["b_fused"]
    tn = params["tn"]
    compute_dtype = params["compute_dtype"]
    F = params["in_features"]

    orig_shape = x.shape
    assert orig_shape[-1] == F
    x2 = x.reshape(-1, F)
    B = x2.shape[0]

    kind = _device_kind()
    is_v5e = ("v5e" in kind) or ("v5 lite" in kind) or ("v5lite" in kind)

    c_bytes = jnp.dtype(compute_dtype).itemsize
    o_bytes = jnp.dtype(x.dtype).itemsize
    sublane = max(8, 32 // max(1, c_bytes))   # 8 f32 / 16 bf16 / 32 int8-fp8

    # --- M tiling ------------------------------------------------------------
    if tm is None:
        # 256-row LHS fills the 2x256^2 MXU on v6e/v7x in the compute-bound
        # (large-B) regime; keep 128 on v5e (128x128 MXU) and small batches.
        tm = 128 if (is_v5e or B < 256) else 256
    tm_eff = min(tm, ((B + sublane - 1) // sublane) * sublane)
    tm_eff = max(sublane, (tm_eff // sublane) * sublane)
    m_tiles = pl.cdiv(B, tm_eff)
    m_pad = m_tiles * tm_eff

    n_tiles = F // tn

    # --- K tiling: decouple VMEM from F (v7x 64 MiB) ---------------------------
    vmem_cap = _vmem_cap_bytes(kind)
    budget = int(0.9 * (_force_vmem_budget or vmem_cap))

    def vmem_needed(tk_):
        return (2 * tm_eff * tk_ * c_bytes          # x      (double-buffered)
                + 2 * tk_ * 2 * tn * c_bytes        # W      (double-buffered)
                + 2 * 2 * tn * 4                    # bias   (double-buffered)
                + 2 * tm_eff * tn * o_bytes         # output (double-buffered)
                + 2 * tm_eff * tn * 4)              # acc1 + acc2 scratch

    tk = F
    while (vmem_needed(tk) > budget and tk % 2 == 0
           and (tk // 2) % 128 == 0 and F % (tk // 2) == 0):
        tk //= 2
    k_tiles = F // tk

    # --- operand prep ----------------------------------------------------------
    x_c = x2.astype(compute_dtype)
    if m_pad != B:
        x_c = jnp.pad(x_c, ((0, m_pad - B), (0, 0)))

    # --- traffic-aware outer-loop order ---------------------------------------
    # (n outer) re-streams x n_tiles times; (m outer) re-streams W m_tiles
    # times. Pick whichever re-streams fewer bytes; on a tie, lead with the
    # larger-extent axis so both v7x TensorCores get work.
    extra_n_outer = (n_tiles - 1) * m_pad * F * c_bytes if m_tiles > 1 else 0
    extra_m_outer = (m_tiles - 1) * 2 * F * F * c_bytes if n_tiles > 1 else 0
    if extra_n_outer != extra_m_outer:
        n_outer = extra_n_outer < extra_m_outer
    else:
        n_outer = n_tiles >= m_tiles

    if n_outer:
        grid = (n_tiles, m_tiles, k_tiles)
        x_map = lambda j, i, k: (i, k)
        w_map = lambda j, i, k: (k, j)
        b_map = lambda j, i, k: (0, j)
        o_map = lambda j, i, k: (i, j)
    else:
        grid = (m_tiles, n_tiles, k_tiles)
        x_map = lambda i, j, k: (i, k)
        w_map = lambda i, j, k: (k, j)
        b_map = lambda i, j, k: (0, j)
        o_map = lambda i, j, k: (i, j)

    # --- cost estimate reflecting the re-streamed operand -----------------------
    if k_tiles > 1:
        x_rf, w_rf = n_tiles, m_tiles
    elif n_outer:
        x_rf, w_rf = (n_tiles if m_tiles > 1 else 1), 1
    else:
        x_rf, w_rf = 1, (m_tiles if n_tiles > 1 else 1)
    cost = pl.CostEstimate(
        flops=4 * m_pad * F * F,                 # two F x F GEMMs
        transcendentals=m_pad * F,               # sigmoid
        bytes_accessed=int(x_rf * m_pad * F * c_bytes
                           + w_rf * 2 * F * F * c_bytes
                           + 2 * F * 4
                           + m_pad * F * o_bytes),
    )

    vmem_limit = int(min(vmem_cap,
                         max(32 * 1024 * 1024, vmem_needed(tk) + (4 << 20))))

    grid_spec = pltpu.PrefetchScalarGridSpec(
        num_scalar_prefetch=0,
        grid=grid,
        in_specs=[
            pl.BlockSpec((tm_eff, tk), x_map),        # x
            pl.BlockSpec((tk, 2 * tn), w_map),        # fused W
            pl.BlockSpec((1, 2 * tn), b_map),         # fused b
        ],
        out_specs=pl.BlockSpec((tm_eff, tn), o_map),
        scratch_shapes=[pltpu.VMEM((tm_eff, tn), jnp.float32),
                        pltpu.VMEM((tm_eff, tn), jnp.float32)],
    )

    out = pl.pallas_call(
        _swiglu_kernel,
        out_shape=jax.ShapeDtypeStruct((m_pad, F), x.dtype),
        grid_spec=grid_spec,
        compiler_params=pltpu.CompilerParams(
            dimension_semantics=("parallel", "parallel", "arbitrary"),
            vmem_limit_bytes=vmem_limit,
        ),
        cost_estimate=cost,
    )(x_c, w_fused, b_fused)

    out = out[:B] if m_pad != B else out
    return out.reshape(orig_shape)


def swiglu(x, w1, b1, w2, b2, beta, *, tn=None, tm=None,
           compute_dtype=jnp.bfloat16, _force_vmem_budget=None):
    """Convenience one-shot wrapper (prefer prepare once + apply many)."""
    params = prepare_swiglu_params(w1, b1, w2, b2, beta, tn=tn,
                                   compute_dtype=compute_dtype)
    return swiglu_apply(x, params, tm=tm, _force_vmem_budget=_force_vmem_budget)


# ----------------------------------------------------------------------------
# Self-test
# ----------------------------------------------------------------------------
if __name__ == "__main__":
    key = jax.random.PRNGKey(0)
    k_x, k_w1, k_b1, k_w2, k_b2, k_x2, k_x3 = jax.random.split(key, 7)

    B = 8            # batch
    F = 512          # in_features -> 2 N-tiles of 256, exercises the grid

    # Deterministic init (mimics nn.Linear's uniform(-1/sqrt(F), 1/sqrt(F)))
    bound = 1.0 / jnp.sqrt(jnp.float32(F))
    x = jax.random.normal(k_x, (B, F), jnp.float32)
    # Stored pre-transposed: columns index output features (x @ w == x @ W^T)
    w1 = jax.random.uniform(k_w1, (F, F), jnp.float32, -bound, bound)
    b1 = jax.random.uniform(k_b1, (F,), jnp.float32, -bound, bound)
    w2 = jax.random.uniform(k_w2, (F, F), jnp.float32, -bound, bound)
    b2 = jax.random.uniform(k_b2, (F,), jnp.float32, -bound, bound)
    beta = jnp.ones((1,), jnp.float32)   # nn.Parameter(torch.ones(1))

    def ref_fn(xx):
        h1 = xx @ w1 + b1
        h2 = xx @ w2 + b2
        return h1 * jax.nn.sigmoid(beta[0] * h2)

    ref = ref_fn(x)

    # 1) f32 compute path: tight tolerance.
    out_f32 = jax.block_until_ready(
        swiglu(x, w1, b1, w2, b2, beta, compute_dtype=jnp.float32))
    assert out_f32.shape == (B, F)
    err = float(jnp.max(jnp.abs(out_f32 - ref)))
    assert jnp.allclose(out_f32, ref, atol=1e-5, rtol=1e-5), err

    # 2) bf16 default perf path: prepare once (hoisted), apply.
    params = prepare_swiglu_params(w1, b1, w2, b2, beta)
    out_bf16 = jax.block_until_ready(swiglu_apply(x, params))
    err = float(jnp.max(jnp.abs(out_bf16 - ref)))
    assert jnp.allclose(out_bf16, ref, atol=5e-2, rtol=5e-2), err

    # 3) Multi-M-tile + batch padding + M-outer ordering (tn = F -> n_tiles=1).
    Bm = 272
    xm = jax.random.normal(k_x2, (Bm, F), jnp.float32)
    params_full = prepare_swiglu_params(w1, b1, w2, b2, beta, tn=F)
    out_m = jax.block_until_ready(swiglu_apply(xm, params_full))
    ref_m = ref_fn(xm)
    err = float(jnp.max(jnp.abs(out_m - ref_m)))
    assert out_m.shape == (Bm, F)
    assert jnp.allclose(out_m, ref_m, atol=5e-2, rtol=5e-2), err

    # 4) K-tiled accumulation path (forced small VMEM budget -> k_tiles > 1).
    Bk = 32
    xk = jax.random.normal(k_x3, (Bk, F), jnp.float32)
    out_k = jax.block_until_ready(
        swiglu_apply(xk, params, _force_vmem_budget=1 << 20))
    ref_k = ref_fn(xk)
    err = float(jnp.max(jnp.abs(out_k - ref_k)))
    assert jnp.allclose(out_k, ref_k, atol=5e-2, rtol=5e-2), err

    print("KERNEL_OK")
</pallas_src>

<mosaic_0001>
module attributes {stable_mosaic.version = 11 : i64} {
  func.func @_swiglu_kernel(%arg0: i32, %arg1: i32, %arg2: i32, %arg3: memref<8x512xf32, #tpu.memory_space<vmem>>, %arg4: memref<512x512xf32, #tpu.memory_space<vmem>>, %arg5: memref<1x512xf32, #tpu.memory_space<vmem>>, %arg6: memref<8x256xf32, #tpu.memory_space<vmem>>, %arg7: memref<8x256xf32, #tpu.memory_space<vmem>>, %arg8: memref<8x256xf32, #tpu.memory_space<vmem>>) attributes {dimension_semantics = [#tpu.dimension_semantics<parallel>, #tpu.dimension_semantics<parallel>, #tpu.dimension_semantics<arbitrary>], iteration_bounds = array<i64: 2, 1, 1>, scalar_prefetch = 0 : i64, scratch_operands = 2 : i64, tpu.core_type = #tpu.core_type<tc>, window_params = [{transform_indices = @transform_0, window_bounds = array<i64: 8, 512>}, {transform_indices = @transform_1, window_bounds = array<i64: 512, 512>}, {transform_indices = @transform_2, window_bounds = array<i64: 1, 512>}, {transform_indices = @transform_3, window_bounds = array<i64: 8, 256>}]} {
    %c0_i32 = arith.constant 0 : i32
    %0 = arith.cmpi eq, %arg2, %c0_i32 : i32
    %1 = arith.extui %0 : i1 to i32
    %c0_i32_0 = arith.constant 0 : i32
    %2 = arith.cmpi ne, %1, %c0_i32_0 : i32
    scf.if %2 {
      %cst_16 = arith.constant 0.000000e+00 : f32
      %17 = vector.broadcast %cst_16 : f32 to vector<8x256xf32>
      %c0_17 = arith.constant 0 : index
      %c0_18 = arith.constant 0 : index
      %18 = vector.load %arg7[%c0_17, %c0_18] : memref<8x256xf32, #tpu.memory_space<vmem>>, vector<8x256xf32>
      tpu.vector_store %arg7[%c0_17, %c0_18], %17 {strides = array<i32>} : memref<8x256xf32, #tpu.memory_space<vmem>>, vector<8x256xf32>,
      %cst_19 = arith.constant 0.000000e+00 : f32
      %19 = vector.broadcast %cst_19 : f32 to vector<8x256xf32>
      %c0_20 = arith.constant 0 : index
      %c0_21 = arith.constant 0 : index
      %20 = vector.load %arg8[%c0_20, %c0_21] : memref<8x256xf32, #tpu.memory_space<vmem>>, vector<8x256xf32>
      tpu.vector_store %arg8[%c0_20, %c0_21], %19 {strides = array<i32>} : memref<8x256xf32, #tpu.memory_space<vmem>>, vector<8x256xf32>,
    } else {
    }
    %c0 = arith.constant 0 : index
    %c0_1 = arith.constant 0 : index
    %3 = vector.load %arg3[%c0, %c0_1] : memref<8x512xf32, #tpu.memory_space<vmem>>, vector<8x512xf32>
    %c0_2 = arith.constant 0 : index
    %c0_3 = arith.constant 0 : index
    %4 = vector.load %arg8[%c0_2, %c0_3] : memref<8x256xf32, #tpu.memory_space<vmem>>, vector<8x256xf32>
    %c0_4 = arith.constant 0 : index
    %c256 = arith.constant 256 : index
    %5 = vector.load %arg4[%c0_4, %c256] : memref<512x512xf32, #tpu.memory_space<vmem>>, vector<512x256xf32>
    %cst = arith.constant dense<0.000000e+00> : vector<8x256xf32>
    %6 = tpu.matmul %3, %5, %cst {dimension_numbers = #tpu.dot_dimension_numbers<[1], [0], [0], [1], [0, 0, 1, 1], [], []>} : vector<8x512xf32>, vector<512x256xf32>, vector<8x256xf32> -> vector<8x256xf32>
    %7 = arith.addf %4, %6 : vector<8x256xf32>
    %c0_5 = arith.constant 0 : index
    %c0_6 = arith.constant 0 : index
    %8 = vector.load %arg8[%c0_5, %c0_6] : memref<8x256xf32, #tpu.memory_space<vmem>>, vector<8x256xf32>
    tpu.vector_store %arg8[%c0_5, %c0_6], %7 {strides = array<i32>} : memref<8x256xf32, #tpu.memory_space<vmem>>, vector<8x256xf32>,
    %c0_7 = arith.constant 0 : index
    %c0_8 = arith.constant 0 : index
    %9 = vector.load %arg7[%c0_7, %c0_8] : memref<8x256xf32, #tpu.memory_space<vmem>>, vector<8x256xf32>
    %c0_9 = arith.constant 0 : index
    %c0_10 = arith.constant 0 : index
    %10 = vector.load %arg4[%c0_9, %c0_10] : memref<512x512xf32, #tpu.memory_space<vmem>>, vector<512x256xf32>
    %cst_11 = arith.constant dense<0.000000e+00> : vector<8x256xf32>
    %11 = tpu.matmul %3, %10, %cst_11 {dimension_numbers = #tpu.dot_dimension_numbers<[1], [0], [0], [1], [0, 0, 1, 1], [], []>} : vector<8x512xf32>, vector<512x256xf32>, vector<8x256xf32> -> vector<8x256xf32>
    %12 = arith.addf %9, %11 : vector<8x256xf32>
    %c0_12 = arith.constant 0 : index
    %c0_13 = arith.constant 0 : index
    %13 = vector.load %arg7[%c0_12, %c0_13] : memref<8x256xf32, #tpu.memory_space<vmem>>, vector<8x256xf32>
    tpu.vector_store %arg7[%c0_12, %c0_13], %12 {strides = array<i32>} : memref<8x256xf32, #tpu.memory_space<vmem>>, vector<8x256xf32>,
    %c0_i32_14 = arith.constant 0 : i32
    %14 = arith.cmpi eq, %arg2, %c0_i32_14 : i32
    %15 = arith.extui %14 : i1 to i32
    %c0_i32_15 = arith.constant 0 : i32
    %16 = arith.cmpi ne, %15, %c0_i32_15 : i32
    scf.if %16 {
      %c0_16 = arith.constant 0 : index
      %c0_17 = arith.constant 0 : index
      %17 = vector.load %arg8[%c0_16, %c0_17] : memref<8x256xf32, #tpu.memory_space<vmem>>, vector<8x256xf32>
      %c0_18 = arith.constant 0 : index
      %c256_19 = arith.constant 256 : index
      %18 = vector.load %arg5[%c0_18, %c256_19] : memref<1x512xf32, #tpu.memory_space<vmem>>, vector<1x256xf32>
      %19 = vector.broadcast %18 : vector<1x256xf32> to vector<8x256xf32>
      %20 = arith.addf %17, %19 : vector<8x256xf32>
      %21 = arith.negf %20 : vector<8x256xf32>
      %22 = math.exp %21 : vector<8x256xf32>
      %cst_20 = arith.constant 1.000000e+00 : f32
      %23 = vector.broadcast %cst_20 : f32 to vector<8x256xf32>
      %24 = arith.addf %23, %22 : vector<8x256xf32>
      %25 = arith.divf %23, %24 : vector<8x256xf32>
      %c0_21 = arith.constant 0 : index
      %c0_22 = arith.constant 0 : index
      %26 = vector.load %arg7[%c0_21, %c0_22] : memref<8x256xf32, #tpu.memory_space<vmem>>, vector<8x256xf32>
      %c0_23 = arith.constant 0 : index
      %c0_24 = arith.constant 0 : index
      %27 = vector.load %arg5[%c0_23, %c0_24] : memref<1x512xf32, #tpu.memory_space<vmem>>, vector<1x256xf32>
      %28 = vector.broadcast %27 : vector<1x256xf32> to vector<8x256xf32>
      %29 = arith.addf %26, %28 : vector<8x256xf32>
      %30 = arith.mulf %29, %25 : vector<8x256xf32>
      %c0_25 = arith.constant 0 : index
      %c0_26 = arith.constant 0 : index
      %31 = vector.load %arg6[%c0_25, %c0_26] : memref<8x256xf32, #tpu.memory_space<vmem>>, vector<8x256xf32>
      tpu.vector_store %arg6[%c0_25, %c0_26], %30 {strides = array<i32>} : memref<8x256xf32, #tpu.memory_space<vmem>>, vector<8x256xf32>,
    } else {
    }
    return
  }
  func.func @transform_0(%arg0: i32, %arg1: i32, %arg2: i32) -> (i32, i32) {
    %c0_i32 = arith.constant 0 : i32
    return %arg1, %arg2 : i32, i32
  }
  func.func @transform_1(%arg0: i32, %arg1: i32, %arg2: i32) -> (i32, i32) {
    %c0_i32 = arith.constant 0 : i32
    return %arg2, %arg0 : i32, i32
  }
  func.func @transform_2(%arg0: i32, %arg1: i32, %arg2: i32) -> (i32, i32) {
    %c0_i32 = arith.constant 0 : i32
    %c0_i32_0 = arith.constant 0 : i32
    return %c0_i32, %arg0 : i32, i32
  }
  func.func @transform_3(%arg0: i32, %arg1: i32, %arg2: i32) -> (i32, i32) {
    %c0_i32 = arith.constant 0 : i32
    return %arg1, %arg0 : i32, i32
  }
}

</mosaic_0001>

<bundles_post_ra>
// kernel: tpu_custom_call.1
= control target key start
LH: loop header
LB: loop body
LE: loop exit
PB: predicated region body
PF: predicated region fallthrough
CT: control target
= control target key end

     0   :  { %s2123_s0 = inlined_call_operand.hbm [shape: f32[8,512], index: 0, kind: input, shape index: {}]   ;;  %s2124_s1 = inlined_call_operand.hbm [shape: f32[512,1024], index: 1, kind: input, shape index: {}]   ;;  %s2125_s2 = inlined_call_operand.hbm [shape: f32[1,1024], index: 2, kind: input, shape index: {}]   ;;  %s2126_s3 = inlined_call_operand.hbm [shape: f32[8,512], index: 3, kind: output, shape index: {}]  }
   0x1   :  { %2132 = sst [smem:[#allocation14_spill]] %s2124_s1 }
   0x2   :  { %8 = vsyncpa [#allocation5], 0 }
   0x3   :  { %9 = vsyncpa [#allocation8], 0 }
   0x4   :  { %11 = vsyncpa [#allocation8 + $0x1], 0 }
   0x5   :  { %12 = vsyncpa [#allocation6], 0 }
   0x6   :  { %14 = vsyncpa [#allocation6 + $0x1], 0  ;;  %s1614_s12 = smov 0   ;;  %s1616_s13 = smov 0  }
   0x7   :  { %s1618_s14 = smov 0   ;;  %s1620_s15 = smov 0  }
   0x8   :  { %s1622_s16 = smov 0   ;;  %s1624_s17 = smov 0  }
   0x9 LB: > { %s39_s18 = sadd.s32 1, %s1581_s16  ;;  %s76_s19 = sadd.s32 1, %s1573_s14  ;;  %s1585_s17 = sphi %s1624_s17, %s20_s17   ;;  %s1581_s16 = sphi %s1622_s16, %s2152_s16   ;;  %s1577_s15 = sphi %s1620_s15, %s2151_s15   ;;  %s1573_s14 = sphi %s1618_s14, %s2150_s14   ;;  %s1569_s13 = sphi %s1616_s13, %s2149_s13   ;;  %s1565_s12 = sphi %s1614_s12, %s2148_s12  }
   0xa   : > { %p41_p0 = scmp.ge.s32.totalorder %s39_s18, 2  ;;  %p83_p1 = scmp.ne.s32.totalorder %s1573_s14, %s1569_s13 }
   0xb   : > { %p84_p2 = scmp.eq.s32.totalorder %s1585_s17, 0  ;;  %p1348_p5 = scmp.lt.s32.totalorder %s1585_s17, 2 }
   0xc   : > { %s2154_s18 = smov (%p41_p0, %s39_s18), 0  ;;  %s183_s21 = sand.u32 1, %s1585_s17  }
   0xd   : > { %p85_p4 = por %p84_p2, %p83_p1  ;;  %s72_s20 = ssub.s32 %s1581_s16, %s2154_s18 }
   0xe   : > { %p74_p6 = scmp.eq.s32.totalorder %s72_s20, 0  ;;  %s185_s22 = sand.u32 1, %s1573_s14  }
   0xf   : > { %s1059_s23 = sshll.u32 %s1581_s16, 9  ;;  %s1041_s25 = sshll.u32 %s185_s22, 11 }
  0x10   : > { %s1662_s24 = scalar_select %p74_p6, %s1573_s14, %s76_s19  }
  0x11   : > { %s2133_s1 = sld [smem:[#allocation14_spill]]  ;;  %p1671_p7 = pnand %p1348_p5, %p85_p4 }
  0x12   : > { %s187_s30 = scalar_lea.vmem [#allocation7], %s1041_s25  ;;  %s1677_s5 = scalar_lea.sflag [#allocation8], %s183_s21 }
  0x13   : > { %s197_s4 = sshll.u32 %s187_s30, 4  ;;  %p1413_p9 = pneg %p1671_p7  ;;  %s1675_s4 = int_to_ptr.vmem [resolvable:$true] %s197_s4 }
  0x17   : > { %s1669_s28 = scalar_lea.hbm %s2133_s1, %s1059_s23  ;;  %s1416_s9 = scalar_lea.hbm %s2133_s1, 65536 }
  0x18   : > { %s1411_s6 = scalar_lea.hbm %s1669_s28, 32768  ;;  %p1417_p12 = scmp.lt.u32.totalorder %s1669_s28, %s2133_s1 }
  0x19   : > { %p1412_p8 = scmp.ne.s32.totalorder %s1669_s28, %s1411_s6  ;;  %p1418_p13 = scmp.lt.u32.totalorder %s1416_s9, %s1411_s6 }
  0x1a   : > { %p1420_p2 = scmp.lt.u32.totalorder %s1411_s6, %s1669_s28 }
  0x1b   : > { %p1414_p10 = pnand %p1413_p9, %p1412_p8  ;;  %p1419_p0 = por %p1418_p13, %p1417_p12 }
  0x1d   : > { %p1415_p11 = pneg %p1414_p10  ;;  %p1421_p4 = por %p1420_p2, %p1419_p0 }
  0x1f   : > { %p1422_p5 = pnand %p1421_p4, %p1415_p11 }
  0x21   : > { %1425 = shalt.err (!%p1422_p5)
}
  0x22   : > { %s1426_s19 = scalar_lea.vmem %s1675_s4, 32768  ;;  %s1587_s20 = smov [#allocation7]  }
  0x23   : > { %p1427_p6 = scmp.ne.s32.totalorder %s1675_s4, %s1426_s19  ;;  %s1431_s21 = sshll.u32 %s1587_s20, 4  ;;  %s1432_s21 = int_to_ptr.vmem [resolvable:$false] %s1431_s21 }
  0x24   : > { %s1433_s23 = scalar_lea.vmem %s1432_s21, 65536  ;;  %p1434_p3 = scmp.lt.s32.totalorder %s1675_s4, %s1432_s21 }
  0x25   : > { %p1429_p8 = pnand %p1427_p6, %p1413_p9  ;;  %p1435_p12 = scmp.lt.s32.totalorder %s1433_s23, %s1426_s19 }
  0x27   : > { %p1430_p10 = pneg %p1429_p8  ;;  %p1436_p13 = por %p1435_p12, %p1434_p3 }
  0x29   : > { %p1437_p0 = pnand %p1436_p13, %p1430_p10 }
  0x2b   : > { %1440 = shalt.err (!%p1437_p0)
}
  0x2c   : > { %s1588_s25 = smov 1024   ;;  %s1589_s26 = smov 512  }
  0x2d   : > { %s1590_s27 = smov 32   ;;  %s1706_s30 = sadd.s32 4294967295, %s1585_s17  }
  0x2e   : > { %1339 = dma.hbm_to_vmem [thread:$0]  (!%p1671_p7), %s1669_s28, 32768, %s1675_s4, %s1677_s5, %s1588_s25, %s1589_s26, %s1590_s27  }
  0x2f   : > { %s1037_s6 = sadd.s32 4294967294, %s1585_s17   ;;  %p89_p3 = scmp.ne.s32.totalorder %s1569_s13, %s1565_s12 }
  0x30   : > { %p2127_p11 = scmp.eq.s32.totalorder %s1706_s30, 0  ;;  %p141_p2 = scmp.eq.s32.totalorder %s1706_s30, 1 }
  0x31   : > { %p147_p4 = scmp.eq.s32.totalorder %s1037_s6, 1  ;;  %p1038_p6 = scmp.ge.s32.totalorder %s1585_s17, 1 }
  0x32   : > { %p1715_p5 = por %p2127_p11, %p89_p3  ;;  %p1723_p8 = por %p141_p2, %p83_p1 }
  0x33   : > { %p1727_p10 = por %p147_p4, %p89_p3  ;;  %p154_p12 = scmp.lt.s32.totalorder %s1585_s17, 3 }
  0x34   : > { %s2135_s7 = scalar_select %p1715_p5, 1, 0 }
  0x35   : > { %s2136_s28 = scalar_select %p1723_p8, 1, 0 }
  0x36   : > { %s2137_s4 = scalar_select %p1727_p10, 1, 0 }
  0x37   : > { %s1044_s8 = sshll.u32 %s185_s22, 2  ;;  %p1734_p13 = pnand %p1038_p6, %p154_p12 }
  0x38   : > { %s1591_s10 = smov [#allocation4]   ;;  %s1060_s19 = sshll.u32 %s1581_s16, 6 }
  0x39   : > { %s2138_s9 = scalar_select %p1734_p13, 1, 0 }
  0x3a   : > { %s172_s11 = sshll.u32 %s1591_s10, 4  ;;  %p1332_p1 = pneg %p1734_p13  ;;  %s1738_s11 = int_to_ptr.vmem [resolvable:$true] %s172_s11 }
  0x3b   : > { %s1746_s23 = scalar_lea.hbm %s2125_s2, %s1060_s19  ;;  %s211_s22 = scalar_lea.vmem [#allocation9], %s1044_s8 }
  0x3c   : > { %s219_s25 = sshll.u32 %s211_s22, 4  ;;  %p1750_p0 = pnand %p1332_p1, %p2127_p11  ;;  %s220_s25 = int_to_ptr.vmem [resolvable:$true] %s219_s25 }
  0x3d   : > { %s1441_s27 = scalar_lea.hbm %s1746_s23, 64  ;;  %s1446_s19 = scalar_lea.hbm %s2125_s2, 128 }
  0x3e   : > { %s2139_s26 = scalar_select %p1750_p0, 1, 0 }
  0x3f   : > { %p1442_p3 = scmp.ne.s32.totalorder %s1746_s23, %s1441_s27  ;;  %p1447_p6 = scmp.lt.u32.totalorder %s1746_s23, %s2125_s2 }
  0x40   : > { %p1448_p12 = scmp.lt.u32.totalorder %s1446_s19, %s1441_s27  ;;  %p1450_p11 = scmp.lt.u32.totalorder %s1441_s27, %s1746_s23 }
  0x41   : > { %p1444_p2 = pnand %p1442_p3, %p1413_p9 }
  0x42   : > { %p1449_p1 = por %p1448_p12, %p1447_p6 }
  0x43   : > { %p1445_p4 = pneg %p1444_p2 }
  0x44   : > { %p1451_p10 = por %p1450_p11, %p1449_p1 }
  0x46   : > { %p1452_p8 = pnand %p1451_p10, %p1445_p4 }
  0x48   : > { %1455 = shalt.err (!%p1452_p8)
}
  0x49   : > { %s1456_s8 = scalar_lea.vmem %s220_s25, 64  ;;  %s1592_s22 = smov [#allocation9]  }
  0x4a   : > { %p1457_p5 = scmp.ne.s32.totalorder %s220_s25, %s1456_s8  ;;  %s1461_s6 = sshll.u32 %s1592_s22, 4  ;;  %s1462_s6 = int_to_ptr.vmem [resolvable:$false] %s1461_s6 }
  0x4b   : > { %s1463_s10 = scalar_lea.vmem %s1462_s6, 128  ;;  %p1464_p13 = scmp.lt.s32.totalorder %s220_s25, %s1462_s6 }
  0x4c   : > { %p1459_p3 = pnand %p1457_p5, %p1413_p9  ;;  %p1465_p0 = scmp.lt.s32.totalorder %s1463_s10, %s1456_s8 }
  0x4e   : > { %p1460_p2 = pneg %p1459_p3  ;;  %p1466_p6 = por %p1465_p0, %p1464_p13 }
  0x50   : > { %p1467_p12 = pnand %p1466_p6, %p1460_p2 }
  0x52   : > { %1470 = shalt.err (!%p1467_p12)
}
  0x53   : > { %1342 = dma.hbm_to_vmem [thread:$0]  (!%p1671_p7), %s1746_s23, 64, %s220_s25, %s1677_s5  }
  0x54   : > { %s1471_s20 = scalar_lea.hbm %s2123_s0, 512  ;;  %p2140_p11 = scmp.ne.s32.totalorder %s2139_s26, 0 }
  0x55   : > { %p1472_p9 = scmp.ne.s32.totalorder %s2123_s0, %s1471_s20  ;;  %p1478_p13 = scmp.lt.u32.totalorder %s1471_s20, %s2123_s0 }
  0x56   : > { %p1473_p5 = pneg %p2140_p11 }
  0x58   : > { %p1474_p8 = pnand %p1473_p5, %p1472_p9 }
  0x5a   : > { %p1475_p10 = pneg %p1474_p8 }
  0x5c   : > { %p1480_p0 = pnand %p1478_p13, %p1475_p10 }
  0x5e   : > { %1483 = shalt.err (!%p1480_p0)
}
  0x5f   : > { %s1484_s29 = scalar_lea.vmem %s1738_s11, 512  ;;  %p1492_p3 = scmp.lt.s32.totalorder %s1738_s11, %s1738_s11 }
  0x60   : > { %p1485_p7 = scmp.ne.s32.totalorder %s1738_s11, %s1484_s29  ;;  %p1493_p2 = scmp.lt.s32.totalorder %s1484_s29, %s1484_s29 }
  0x62   : > { %p1487_p4 = pnand %p1485_p7, %p1473_p5  ;;  %p1494_p6 = por %p1493_p2, %p1492_p3 }
  0x64   : > { %p1488_p1 = pneg %p1487_p4 }
  0x66   : > { %p1495_p12 = pnand %p1494_p6, %p1488_p1 }
  0x68   : > { %1498 = shalt.err (!%p1495_p12)
}
  0x69   : > { %1335 = dma.hbm_to_vmem [thread:$0]  (!%p2140_p11), %s2123_s0, 512, %s1738_s11, [#allocation5]  }
  0x6a   : > { %p2141_p9 = scmp.ne.s32.totalorder %s2138_s9, 0 }
  0x6b   : > { %p2142_p8 = scmp.eq.s32.totalorder (!%p2141_p9), %s1706_s30, 0 }
  0x6c   : > { %228 = sbr.rel (%p2141_p9) target bundleno = 510 (0x1fe), region = 32 }
  0x73   : > { %1552 = dma.done.wait (%p2142_p8), [#allocation5], 512   ;;  %p2143_p5 = pmov %p2142_p8 }
  0x74   : > { %s234_s23 = sand.u32 1, %s1706_s30   ;;  %s1803_s25 = sand.u32 1, %s1569_s13  }
  0x75   : > { %1554 = vsyncadd (%p2143_p5), [#allocation5], 4294966784  ;;  %s1049_s26 = sshll.u32 %s1803_s25, 11  ;;  %s235_s6 = scalar_lea.sflag [#allocation8], %s234_s23 }
  0x76   : > { %s1806_s10 = scalar_lea.vmem [#allocation7], %s1049_s26  ;;  %p2144_p11 = scmp.ne.s32.totalorder %s2135_s7, 0 }
  0x78   : > { %1556 = dma.done.wait (%p2144_p11), %s235_s6, 32832  }
  0x79   : > { %1558 = vsyncadd (%p2144_p11), %s235_s6, 4294934464  ;;  %v295_v0 = vld [vmem:[%s1806_s10 + $0x18] sm:$0xff]  ;;  %v571_v2 = vld [vmem:[%s1806_s10 + $0x8] sm:$0xff]  ;;  %s1050_s30 = sshll.u32 %s1803_s25, 2  ;;  %s1051_s9 = sshll.u32 %s1803_s25, 4 }
  0x7a   : > { %v297_v1 = vld [vmem:[%s1806_s10 + $0x38] sm:$0xff]  ;;  %v573_v4 = vld [vmem:[%s1806_s10 + $0x28] sm:$0xff]  ;;  %v294_v5 = vld [vmem:[%s1806_s10 + $0x10] sm:$0xff]  ;;  %s247_s7 = scalar_lea.vmem [#allocation9], %s1050_s30  ;;  %s1061_s11 = sshll.u32 %s1577_s15, 8 }
  0x7b   : > { %v1062_v3 = vpack.c.bf16 %v297_v1, %v295_v0  ;;  %v296_v6 = vld [vmem:[%s1806_s10 + $0x30] sm:$0xff]  ;;  %v1190_v7 = vpack.c.bf16 %v573_v4, %v571_v2  ;;  %v570_v9 = vld [vmem:[%s1806_s10] sm:$0xff]  ;;  %v299_v11 = vld [vmem:[%s1806_s10 + $0x58] sm:$0xff]  ;;  %s274_s27 = scalar_lea.vmem [#allocation10], %s1051_s9  ;;  %s2074_s8 = scalar_lea.hbm %s2126_s3, %s1061_s11 }
  0x7c   : > { %v1064_v8 = vpack.c.bf16 %v296_v6, %v294_v5  ;;  %v572_v10 = vld [vmem:[%s1806_s10 + $0x20] sm:$0xff]  ;;  %v301_v13 = vld [vmem:[%s1806_s10 + $0x78] sm:$0xff]  ;;  %v575_v14 = vld [vmem:[%s1806_s10 + $0x48] sm:$0xff]  ;;  %s912_s19 = sshll.u32 %s274_s27, 4  ;;  %s896_s15 = scalar_lea.sflag [#allocation6], %s1803_s25  ;;  %s2076_s19 = int_to_ptr.vmem [resolvable:$true] %s912_s19 }
  0x7d   : > { %1063 = vmatprep.subr.bf16.mxu0 %v1062_v3  ;;  %v1192_v12 = vpack.c.bf16 %v572_v10, %v570_v9  ;;  %v577_v15 = vld [vmem:[%s1806_s10 + $0x68] sm:$0xff]  ;;  %1191 = vmatprep.subr.bf16.mxu1 %v1190_v7  ;;  %v1066_v16 = vpack.c.bf16 %v301_v13, %v299_v11  ;;  %v298_v18 = vld [vmem:[%s1806_s10 + $0x50] sm:$0xff]  ;;  %v574_v20 = vld [vmem:[%s1806_s10 + $0x40] sm:$0xff]  ;;  %s1499_s22 = scalar_lea.vmem %s2076_s19, 256  ;;  %p2145_p13 = scmp.ne.s32.totalorder %s2136_s28, 0 }
  0x7e   : > { %1065 = vmatpush1.bf16.msra.mxu0 %v1064_v8  ;;  %v1194_v17 = vpack.c.bf16 %v577_v15, %v575_v14  ;;  %v300_v19 = vld [vmem:[%s1806_s10 + $0x70] sm:$0xff]  ;;  %v576_v22 = vld [vmem:[%s1806_s10 + $0x60] sm:$0xff]  ;;  %v303_v23 = vld [vmem:[%s1806_s10 + $0x98] sm:$0xff]  ;;  %p1500_p10 = scmp.ne.s32.totalorder %s2076_s19, %s1499_s22  ;;  %s1593_s29 = smov [#allocation10]  }
  0x7f   : > { %1193 = vmatpush1.bf16.msra.mxu1 %v1192_v12  ;;  %v1068_v21 = vpack.c.bf16 %v300_v19, %v298_v18  ;;  %v305_v24 = vld [vmem:[%s1806_s10 + $0xb8] sm:$0xff]  ;;  %1067 = vmatprep.subr.bf16.mxu0 %v1066_v16  ;;  %v1196_v25 = vpack.c.bf16 %v576_v22, %v574_v20  ;;  %v579_v27 = vld [vmem:[%s1806_s10 + $0x88] sm:$0xff]  ;;  %v302_v29 = vld [vmem:[%s1806_s10 + $0x90] sm:$0xff]  ;;  %s1503_s1 = sshll.u32 %s1593_s29, 4  ;;  %s1504_s1 = int_to_ptr.vmem [resolvable:$false] %s1503_s1 }
  0x80   : > { %1195 = vmatprep.subr.bf16.mxu1 %v1194_v17  ;;  %v1070_v26 = vpack.c.bf16 %v305_v24, %v303_v23  ;;  %v581_v28 = vld [vmem:[%s1806_s10 + $0xa8] sm:$0xff]  ;;  %v304_v31 = vld [vmem:[%s1806_s10 + $0xb0] sm:$0xff]  ;;  %v578_v32 = vld [vmem:[%s1806_s10 + $0x80] sm:$0xff]  ;;  %p1501_p0 = pnand %p1500_p10, %p2145_p13  ;;  %s1505_s5 = scalar_lea.vmem %s1504_s1, 512 }
  0x81   : > { %v1198_v30 = vpack.c.bf16 %v581_v28, %v579_v27  ;;  %v580_v33 = vld [vmem:[%s1806_s10 + $0xa0] sm:$0xff]  ;;  %v1072_v34 = vpack.c.bf16 %v304_v31, %v302_v29  ;;  %v307_v35 = vld [vmem:[%s1806_s10 + $0xd8] sm:$0xff]  ;;  %v583_v37 = vld [vmem:[%s1806_s10 + $0xc8] sm:$0xff]  ;;  %p1506_p4 = scmp.lt.s32.totalorder %s2076_s19, %s1504_s1  ;;  %p1507_p1 = scmp.lt.s32.totalorder %s1505_s5, %s1499_s22 }
  0x82   : > { %1069 = vmatpush1.bf16.msra.mxu0 %v1068_v21  ;;  %v309_v36 = vld [vmem:[%s1806_s10 + $0xf8] sm:$0xff]  ;;  %v1200_v38 = vpack.c.bf16 %v580_v33, %v578_v32  ;;  %v585_v40 = vld [vmem:[%s1806_s10 + $0xe8] sm:$0xff]  ;;  %v306_v41 = vld [vmem:[%s1806_s10 + $0xd0] sm:$0xff]  ;;  %p1502_p7 = pneg %p1501_p0 }
  0x83   : > { %1197 = vmatpush1.bf16.msra.mxu1 %v1196_v25  ;;  %1071 = vmatprep.subr.bf16.mxu0 %v1070_v26  ;;  %v1074_v39 = vpack.c.bf16 %v309_v36, %v307_v35  ;;  %v308_v42 = vld [vmem:[%s1806_s10 + $0xf0] sm:$0xff]  ;;  %v1202_v43 = vpack.c.bf16 %v585_v40, %v583_v37  ;;  %v582_v44 = vld [vmem:[%s1806_s10 + $0xc0] sm:$0xff]  ;;  %v311_v46 = vld [vmem:[%s1806_s10 + $0x118] sm:$0xff]  ;;  %p1508_p3 = por %p1507_p1, %p1506_p4 }
  0x84   : > { %1199 = vmatprep.subr.bf16.mxu1 %v1198_v30  ;;  %v584_v45 = vld [vmem:[%s1806_s10 + $0xe0] sm:$0xff]  ;;  %v313_v47 = vld [vmem:[%s1806_s10 + $0x138] sm:$0xff]  ;;  %v587_v48 = vld [vmem:[%s1806_s10 + $0x108] sm:$0xff]  ;;  %v1076_v50 = vpack.c.bf16 %v308_v42, %v306_v41 }
  0x85   : > { %v589_v49 = vld [vmem:[%s1806_s10 + $0x128] sm:$0xff]  ;;  %v1204_v51 = vpack.c.bf16 %v584_v45, %v582_v44  ;;  %v1078_v52 = vpack.c.bf16 %v313_v47, %v311_v46  ;;  %v310_v53 = vld [vmem:[%s1806_s10 + $0x110] sm:$0xff]  ;;  %v586_v55 = vld [vmem:[%s1806_s10 + $0x100] sm:$0xff]  ;;  %p1509_p2 = pnand %p1508_p3, %p1502_p7 }
  0x86   : > { %1073 = vmatpush1.bf16.msra.mxu0 %v1072_v34  ;;  %v312_v54 = vld [vmem:[%s1806_s10 + $0x130] sm:$0xff]  ;;  %v1206_v56 = vpack.c.bf16 %v589_v49, %v587_v48  ;;  %v588_v57 = vld [vmem:[%s1806_s10 + $0x120] sm:$0xff]  ;;  %v315_v58 = vld [vmem:[%s1806_s10 + $0x158] sm:$0xff] }
  0x87   : > { %1201 = vmatpush1.bf16.msra.mxu1 %v1200_v38  ;;  %1075 = vmatprep.subr.bf16.mxu0 %v1074_v39  ;;  %v317_v59 = vld [vmem:[%s1806_s10 + $0x178] sm:$0xff]  ;;  %v591_v60 = vld [vmem:[%s1806_s10 + $0x148] sm:$0xff]  ;;  %v1080_v62 = vpack.c.bf16 %v312_v54, %v310_v53  ;;  %v1208_v63 = vpack.c.bf16 %v588_v57, %v586_v55  ;;  %v314_v1 = vld [vmem:[%s1806_s10 + $0x150] sm:$0xff] }
  0x88   : > { %1203 = vmatprep.subr.bf16.mxu1 %v1202_v43  ;;  %v593_v61 = vld [vmem:[%s1806_s10 + $0x168] sm:$0xff]  ;;  %v1082_v0 = vpack.c.bf16 %v317_v59, %v315_v58  ;;  %v316_v2 = vld [vmem:[%s1806_s10 + $0x170] sm:$0xff]  ;;  %v590_v3 = vld [vmem:[%s1806_s10 + $0x140] sm:$0xff] }
  0x89   : > { %v1210_v4 = vpack.c.bf16 %v593_v61, %v591_v60  ;;  %v592_v5 = vld [vmem:[%s1806_s10 + $0x160] sm:$0xff]  ;;  %v319_v6 = vld [vmem:[%s1806_s10 + $0x198] sm:$0xff]  ;;  %v595_v8 = vld [vmem:[%s1806_s10 + $0x188] sm:$0xff]  ;;  %v1084_v10 = vpack.c.bf16 %v316_v2, %v314_v1 }
  0x8a   : > { %1077 = vmatpush1.bf16.msra.mxu0 %v1076_v50  ;;  %v321_v7 = vld [vmem:[%s1806_s10 + $0x1b8] sm:$0xff]  ;;  %v597_v9 = vld [vmem:[%s1806_s10 + $0x1a8] sm:$0xff]  ;;  %v1212_v11 = vpack.c.bf16 %v592_v5, %v590_v3  ;;  %v318_v13 = vld [vmem:[%s1806_s10 + $0x190] sm:$0xff] }
  0x8b   : > { %1205 = vmatpush1.bf16.msra.mxu1 %v1204_v51  ;;  %1079 = vmatprep.subr.bf16.mxu0 %v1078_v52  ;;  %v1086_v12 = vpack.c.bf16 %v321_v7, %v319_v6  ;;  %v320_v14 = vld [vmem:[%s1806_s10 + $0x1b0] sm:$0xff]  ;;  %v594_v15 = vld [vmem:[%s1806_s10 + $0x180] sm:$0xff]  ;;  %v1214_v16 = vpack.c.bf16 %v597_v9, %v595_v8  ;;  %v323_v18 = vld [vmem:[%s1806_s10 + $0x1d8] sm:$0xff] }
  0x8c   : > { %1207 = vmatprep.subr.bf16.mxu1 %v1206_v56  ;;  %v596_v17 = vld [vmem:[%s1806_s10 + $0x1a0] sm:$0xff]  ;;  %v325_v19 = vld [vmem:[%s1806_s10 + $0x1f8] sm:$0xff]  ;;  %v599_v20 = vld [vmem:[%s1806_s10 + $0x1c8] sm:$0xff]  ;;  %v1088_v22 = vpack.c.bf16 %v320_v14, %v318_v13 }
  0x8d   : > { %v601_v21 = vld [vmem:[%s1806_s10 + $0x1e8] sm:$0xff]  ;;  %v1216_v23 = vpack.c.bf16 %v596_v17, %v594_v15  ;;  %v1090_v24 = vpack.c.bf16 %v325_v19, %v323_v18  ;;  %v322_v25 = vld [vmem:[%s1806_s10 + $0x1d0] sm:$0xff]  ;;  %v598_v27 = vld [vmem:[%s1806_s10 + $0x1c0] sm:$0xff] }
  0x8e   : > { %1081 = vmatpush1.bf16.msra.mxu0 %v1080_v62  ;;  %v324_v26 = vld [vmem:[%s1806_s10 + $0x1f0] sm:$0xff]  ;;  %v1218_v28 = vpack.c.bf16 %v601_v21, %v599_v20  ;;  %v600_v29 = vld [vmem:[%s1806_s10 + $0x1e0] sm:$0xff]  ;;  %v327_v30 = vld [vmem:[%s1806_s10 + $0x218] sm:$0xff] }
  0x8f   : > { %1209 = vmatpush1.bf16.msra.mxu1 %v1208_v63  ;;  %1083 = vmatprep.subr.bf16.mxu0 %v1082_v0  ;;  %v329_v31 = vld [vmem:[%s1806_s10 + $0x238] sm:$0xff]  ;;  %v603_v32 = vld [vmem:[%s1806_s10 + $0x208] sm:$0xff]  ;;  %v1092_v34 = vpack.c.bf16 %v324_v26, %v322_v25  ;;  %v1220_v35 = vpack.c.bf16 %v600_v29, %v598_v27  ;;  %v326_v37 = vld [vmem:[%s1806_s10 + $0x210] sm:$0xff] }
  0x90   : > { %1211 = vmatprep.subr.bf16.mxu1 %v1210_v4  ;;  %v605_v33 = vld [vmem:[%s1806_s10 + $0x228] sm:$0xff]  ;;  %v1094_v36 = vpack.c.bf16 %v329_v31, %v327_v30  ;;  %v328_v38 = vld [vmem:[%s1806_s10 + $0x230] sm:$0xff]  ;;  %v602_v39 = vld [vmem:[%s1806_s10 + $0x200] sm:$0xff] }
  0x91   : > { %v1222_v40 = vpack.c.bf16 %v605_v33, %v603_v32  ;;  %v604_v41 = vld [vmem:[%s1806_s10 + $0x220] sm:$0xff]  ;;  %v331_v42 = vld [vmem:[%s1806_s10 + $0x258] sm:$0xff]  ;;  %v607_v44 = vld [vmem:[%s1806_s10 + $0x248] sm:$0xff]  ;;  %v1096_v46 = vpack.c.bf16 %v328_v38, %v326_v37 }
  0x92   : > { %1085 = vmatpush1.bf16.msra.mxu0 %v1084_v10  ;;  %v333_v43 = vld [vmem:[%s1806_s10 + $0x278] sm:$0xff]  ;;  %v609_v45 = vld [vmem:[%s1806_s10 + $0x268] sm:$0xff]  ;;  %v1224_v47 = vpack.c.bf16 %v604_v41, %v602_v39  ;;  %v330_v49 = vld [vmem:[%s1806_s10 + $0x250] sm:$0xff] }
  0x93   : > { %1213 = vmatpush1.bf16.msra.mxu1 %v1212_v11  ;;  %1087 = vmatprep.subr.bf16.mxu0 %v1086_v12  ;;  %v1098_v48 = vpack.c.bf16 %v333_v43, %v331_v42  ;;  %v332_v50 = vld [vmem:[%s1806_s10 + $0x270] sm:$0xff]  ;;  %v606_v51 = vld [vmem:[%s1806_s10 + $0x240] sm:$0xff]  ;;  %v1226_v52 = vpack.c.bf16 %v609_v45, %v607_v44  ;;  %v335_v54 = vld [vmem:[%s1806_s10 + $0x298] sm:$0xff] }
  0x94   : > { %1215 = vmatprep.subr.bf16.mxu1 %v1214_v16  ;;  %v608_v53 = vld [vmem:[%s1806_s10 + $0x260] sm:$0xff]  ;;  %v337_v55 = vld [vmem:[%s1806_s10 + $0x2b8] sm:$0xff]  ;;  %v611_v56 = vld [vmem:[%s1806_s10 + $0x288] sm:$0xff]  ;;  %v1100_v58 = vpack.c.bf16 %v332_v50, %v330_v49 }
  0x95   : > { %v613_v57 = vld [vmem:[%s1806_s10 + $0x2a8] sm:$0xff]  ;;  %v1228_v59 = vpack.c.bf16 %v608_v53, %v606_v51  ;;  %v1102_v60 = vpack.c.bf16 %v337_v55, %v335_v54  ;;  %v334_v61 = vld [vmem:[%s1806_s10 + $0x290] sm:$0xff]  ;;  %v610_v63 = vld [vmem:[%s1806_s10 + $0x280] sm:$0xff] }
  0x96   : > { %1089 = vmatpush1.bf16.msra.mxu0 %v1088_v22  ;;  %v336_v62 = vld [vmem:[%s1806_s10 + $0x2b0] sm:$0xff]  ;;  %v1230_v0 = vpack.c.bf16 %v613_v57, %v611_v56  ;;  %v612_v1 = vld [vmem:[%s1806_s10 + $0x2a0] sm:$0xff]  ;;  %v339_v2 = vld [vmem:[%s1806_s10 + $0x2d8] sm:$0xff] }
  0x97   : > { %1217 = vmatpush1.bf16.msra.mxu1 %v1216_v23  ;;  %1091 = vmatprep.subr.bf16.mxu0 %v1090_v24  ;;  %v341_v3 = vld [vmem:[%s1806_s10 + $0x2f8] sm:$0xff]  ;;  %v615_v4 = vld [vmem:[%s1806_s10 + $0x2c8] sm:$0xff]  ;;  %v1104_v6 = vpack.c.bf16 %v336_v62, %v334_v61  ;;  %v338_v7 = vld [vmem:[%s1806_s10 + $0x2d0] sm:$0xff]  ;;  %v1232_v8 = vpack.c.bf16 %v612_v1, %v610_v63 }
  0x98   : > { %1219 = vmatprep.subr.bf16.mxu1 %v1218_v28  ;;  %v617_v5 = vld [vmem:[%s1806_s10 + $0x2e8] sm:$0xff]  ;;  %v1106_v9 = vpack.c.bf16 %v341_v3, %v339_v2  ;;  %v340_v10 = vld [vmem:[%s1806_s10 + $0x2f0] sm:$0xff]  ;;  %v614_v11 = vld [vmem:[%s1806_s10 + $0x2c0] sm:$0xff] }
  0x99   : > { %v616_v12 = vld [vmem:[%s1806_s10 + $0x2e0] sm:$0xff]  ;;  %v1234_v13 = vpack.c.bf16 %v617_v5, %v615_v4  ;;  %v343_v14 = vld [vmem:[%s1806_s10 + $0x318] sm:$0xff]  ;;  %v289_v16 = vld [vmem:[#allocation4 + $0x8] sm:$0xff]  ;;  %v1108_v19 = vpack.c.bf16 %v340_v10, %v338_v7 }
  0x9a   : > { %1093 = vmatpush1.bf16.msra.mxu0 %v1092_v34  ;;  %v345_v15 = vld [vmem:[%s1806_s10 + $0x338] sm:$0xff]  ;;  %v619_v17 = vld [vmem:[%s1806_s10 + $0x308] sm:$0xff]  ;;  %486 = vmatprep.mubr.f32.mxu0 %v289_v16  ;;  %v1236_v20 = vpack.c.bf16 %v616_v12, %v614_v11  ;;  %v342_v22 = vld [vmem:[%s1806_s10 + $0x310] sm:$0xff] }
  0x9b   : > { %1221 = vmatpush1.bf16.msra.mxu1 %v1220_v35  ;;  %1095 = vmatprep.subr.bf16.mxu0 %v1094_v36  ;;  %v621_v18 = vld [vmem:[%s1806_s10 + $0x328] sm:$0xff]  ;;  %v1110_v21 = vpack.c.bf16 %v345_v15, %v343_v14  ;;  %v344_v23 = vld [vmem:[%s1806_s10 + $0x330] sm:$0xff]  ;;  %v618_v24 = vld [vmem:[%s1806_s10 + $0x300] sm:$0xff] }
  0x9c   : > { %1223 = vmatprep.subr.bf16.mxu1 %v1222_v40  ;;  %762 = vmatprep.mubr.f32.mxu1 %v289_v16  ;;  %v1238_v25 = vpack.c.bf16 %v621_v18, %v619_v17  ;;  %v620_v26 = vld [vmem:[%s1806_s10 + $0x320] sm:$0xff]  ;;  %v347_v27 = vld [vmem:[%s1806_s10 + $0x358] sm:$0xff]  ;;  %v623_v29 = vld [vmem:[%s1806_s10 + $0x348] sm:$0xff]  ;;  %v1112_v31 = vpack.c.bf16 %v344_v23, %v342_v22 }
  0x9d   : > { %v349_v28 = vld [vmem:[%s1806_s10 + $0x378] sm:$0xff]  ;;  %v625_v30 = vld [vmem:[%s1806_s10 + $0x368] sm:$0xff]  ;;  %v1240_v32 = vpack.c.bf16 %v620_v26, %v618_v24  ;;  %v346_v34 = vld [vmem:[%s1806_s10 + $0x350] sm:$0xff] }
  0x9e   : > { %1097 = vmatpush1.bf16.msra.mxu0 %v1096_v46  ;;  %v1114_v33 = vpack.c.bf16 %v349_v28, %v347_v27  ;;  %v348_v35 = vld [vmem:[%s1806_s10 + $0x370] sm:$0xff]  ;;  %v622_v36 = vld [vmem:[%s1806_s10 + $0x340] sm:$0xff]  ;;  %v1242_v37 = vpack.c.bf16 %v625_v30, %v623_v29  ;;  %v351_v39 = vld [vmem:[%s1806_s10 + $0x398] sm:$0xff] }
  0x9f   : > { %1225 = vmatpush1.bf16.msra.mxu1 %v1224_v47  ;;  %1099 = vmatprep.subr.bf16.mxu0 %v1098_v48  ;;  %v624_v38 = vld [vmem:[%s1806_s10 + $0x360] sm:$0xff]  ;;  %v353_v40 = vld [vmem:[%s1806_s10 + $0x3b8] sm:$0xff]  ;;  %v627_v41 = vld [vmem:[%s1806_s10 + $0x388] sm:$0xff]  ;;  %v1116_v43 = vpack.c.bf16 %v348_v35, %v346_v34 }
  0xa0   : > { %1227 = vmatprep.subr.bf16.mxu1 %v1226_v52  ;;  %v629_v42 = vld [vmem:[%s1806_s10 + $0x3a8] sm:$0xff]  ;;  %v1244_v44 = vpack.c.bf16 %v624_v38, %v622_v36  ;;  %v1118_v45 = vpack.c.bf16 %v353_v40, %v351_v39  ;;  %v350_v46 = vld [vmem:[%s1806_s10 + $0x390] sm:$0xff]  ;;  %v626_v48 = vld [vmem:[%s1806_s10 + $0x380] sm:$0xff] }
  0xa1   : > { %v352_v47 = vld [vmem:[%s1806_s10 + $0x3b0] sm:$0xff]  ;;  %v1246_v49 = vpack.c.bf16 %v629_v42, %v627_v41  ;;  %v628_v50 = vld [vmem:[%s1806_s10 + $0x3a0] sm:$0xff]  ;;  %v355_v51 = vld [vmem:[%s1806_s10 + $0x3d8] sm:$0xff] }
  0xa2   : > { %1101 = vmatpush1.bf16.msra.mxu0 %v1100_v58  ;;  %v357_v52 = vld [vmem:[%s1806_s10 + $0x3f8] sm:$0xff]  ;;  %v631_v53 = vld [vmem:[%s1806_s10 + $0x3c8] sm:$0xff]  ;;  %v1120_v55 = vpack.c.bf16 %v352_v47, %v350_v46  ;;  %v1248_v56 = vpack.c.bf16 %v628_v50, %v626_v48  ;;  %v354_v58 = vld [vmem:[%s1806_s10 + $0x3d0] sm:$0xff] }
  0xa3   : > { %1229 = vmatpush1.bf16.msra.mxu1 %v1228_v59  ;;  %1103 = vmatprep.subr.bf16.mxu0 %v1102_v60  ;;  %v633_v54 = vld [vmem:[%s1806_s10 + $0x3e8] sm:$0xff]  ;;  %v1122_v57 = vpack.c.bf16 %v357_v52, %v355_v51  ;;  %v356_v59 = vld [vmem:[%s1806_s10 + $0x3f0] sm:$0xff]  ;;  %v630_v60 = vld [vmem:[%s1806_s10 + $0x3c0] sm:$0xff] }
  0xa4   : > { %1231 = vmatprep.subr.bf16.mxu1 %v1230_v0  ;;  %v1250_v61 = vpack.c.bf16 %v633_v54, %v631_v53  ;;  %v632_v62 = vld [vmem:[%s1806_s10 + $0x3e0] sm:$0xff]  ;;  %v359_v63 = vld [vmem:[%s1806_s10 + $0x418] sm:$0xff]  ;;  %v635_v1 = vld [vmem:[%s1806_s10 + $0x408] sm:$0xff]  ;;  %v1124_v3 = vpack.c.bf16 %v356_v59, %v354_v58 }
  0xa5   : > { %v361_v0 = vld [vmem:[%s1806_s10 + $0x438] sm:$0xff]  ;;  %v637_v2 = vld [vmem:[%s1806_s10 + $0x428] sm:$0xff]  ;;  %v1252_v4 = vpack.c.bf16 %v632_v62, %v630_v60  ;;  %v360_v7 = vld [vmem:[%s1806_s10 + $0x430] sm:$0xff] }
  0xa6   : > { %1105 = vmatpush1.bf16.msra.mxu0 %v1104_v6  ;;  %v1126_v5 = vpack.c.bf16 %v361_v0, %v359_v63  ;;  %v358_v6 = vld [vmem:[%s1806_s10 + $0x410] sm:$0xff]  ;;  %v636_v10 = vld [vmem:[%s1806_s10 + $0x420] sm:$0xff]  ;;  %v363_v11 = vld [vmem:[%s1806_s10 + $0x458] sm:$0xff] }
  0xa7   : > { %1233 = vmatpush1.bf16.msra.mxu1 %v1232_v8  ;;  %1107 = vmatprep.subr.bf16.mxu0 %v1106_v9  ;;  %v634_v8 = vld [vmem:[%s1806_s10 + $0x400] sm:$0xff]  ;;  %v1254_v9 = vpack.c.bf16 %v637_v2, %v635_v1  ;;  %v365_v12 = vld [vmem:[%s1806_s10 + $0x478] sm:$0xff]  ;;  %v641_v14 = vld [vmem:[%s1806_s10 + $0x468] sm:$0xff]  ;;  %v1128_v16 = vpack.c.bf16 %v360_v7, %v358_v6 }
  0xa8   : > { %1235 = vmatprep.subr.bf16.mxu1 %v1234_v13  ;;  %v639_v13 = vld [vmem:[%s1806_s10 + $0x448] sm:$0xff]  ;;  %v288_v15 = vld [vmem:[#allocation4] sm:$0xff]  ;;  %v1256_v17 = vpack.c.bf16 %v636_v10, %v634_v8  ;;  %v1130_v18 = vpack.c.bf16 %v365_v12, %v363_v11  ;;  %v367_v24 = vld [vmem:[%s1806_s10 + $0x498] sm:$0xff] }
  0xa9   : > { %v1258_v22 = vpack.c.bf16 %v641_v14, %v639_v13  ;;  %v640_v23 = vld [vmem:[%s1806_s10 + $0x460] sm:$0xff]  ;;  %v643_v26 = vld [vmem:[%s1806_s10 + $0x488] sm:$0xff]  ;;  %v371_v36 = vld [vmem:[%s1806_s10 + $0x4d8] sm:$0xff] }
  0xaa   : > { %1109 = vmatpush1.bf16.msra.mxu0 %v1108_v19  ;;  %v362_v19 = vld [vmem:[%s1806_s10 + $0x450] sm:$0xff]  ;;  %v645_v27 = vld [vmem:[%s1806_s10 + $0x4a8] sm:$0xff]  ;;  %v644_v35 = vld [vmem:[%s1806_s10 + $0x4a0] sm:$0xff] }
  0xab   : > { %1237 = vmatpush1.bf16.msra.mxu1 %v1236_v20  ;;  %1111 = vmatprep.subr.bf16.mxu0 %v1110_v21  ;;  %v364_v20 = vld [vmem:[%s1806_s10 + $0x470] sm:$0xff]  ;;  %v638_v21 = vld [vmem:[%s1806_s10 + $0x440] sm:$0xff]  ;;  %v1262_v34 = vpack.c.bf16 %v645_v27, %v643_v26  ;;  %v647_v38 = vld [vmem:[%s1806_s10 + $0x4c8] sm:$0xff] }
  0xac   : > { %1239 = vmatprep.subr.bf16.mxu1 %v1238_v25  ;;  %v369_v25 = vld [vmem:[%s1806_s10 + $0x4b8] sm:$0xff]  ;;  %v1132_v28 = vpack.c.bf16 %v364_v20, %v362_v19  ;;  %v1260_v29 = vpack.c.bf16 %v640_v23, %v638_v21  ;;  %v649_v39 = vld [vmem:[%s1806_s10 + $0x4e8] sm:$0xff]  ;;  %v648_v47 = vld [vmem:[%s1806_s10 + $0x4e0] sm:$0xff] }
  0xad   : > { %v1134_v30 = vpack.c.bf16 %v369_v25, %v367_v24  ;;  %v1266_v46 = vpack.c.bf16 %v649_v39, %v647_v38  ;;  %v375_v48 = vld [vmem:[%s1806_s10 + $0x518] sm:$0xff]  ;;  %v651_v50 = vld [vmem:[%s1806_s10 + $0x508] sm:$0xff]  ;;  %v652_v59 = vld [vmem:[%s1806_s10 + $0x520] sm:$0xff] }
  0xae   : > { %1113 = vmatpush1.bf16.msra.mxu0 %v1112_v31  ;;  %v366_v31 = vld [vmem:[%s1806_s10 + $0x490] sm:$0xff]  ;;  %v653_v51 = vld [vmem:[%s1806_s10 + $0x528] sm:$0xff]  ;;  %v379_v60 = vld [vmem:[%s1806_s10 + $0x558] sm:$0xff] }
  0xaf   : > { %1241 = vmatpush1.bf16.msra.mxu1 %v1240_v32  ;;  %1115 = vmatprep.subr.bf16.mxu0 %v1114_v33  ;;  %v368_v32 = vld [vmem:[%s1806_s10 + $0x4b0] sm:$0xff]  ;;  %v642_v33 = vld [vmem:[%s1806_s10 + $0x480] sm:$0xff]  ;;  %v1270_v58 = vpack.c.bf16 %v653_v51, %v651_v50  ;;  %v655_v62 = vld [vmem:[%s1806_s10 + $0x548] sm:$0xff] }
  0xb0   : > { %1243 = vmatprep.subr.bf16.mxu1 %v1242_v37  ;;  %v373_v37 = vld [vmem:[%s1806_s10 + $0x4f8] sm:$0xff]  ;;  %v1136_v40 = vpack.c.bf16 %v368_v32, %v366_v31  ;;  %v1264_v41 = vpack.c.bf16 %v644_v35, %v642_v33  ;;  %v657_v63 = vld [vmem:[%s1806_s10 + $0x568] sm:$0xff]  ;;  %v656_v7 = vld [vmem:[%s1806_s10 + $0x560] sm:$0xff] }
  0xb1   : > { %v1138_v42 = vpack.c.bf16 %v373_v37, %v371_v36  ;;  %v1274_v6 = vpack.c.bf16 %v657_v63, %v655_v62  ;;  %v383_v8 = vld [vmem:[%s1806_s10 + $0x598] sm:$0xff]  ;;  %v659_v10 = vld [vmem:[%s1806_s10 + $0x588] sm:$0xff]  ;;  %v382_v13 = vld [vmem:[%s1806_s10 + $0x590] sm:$0xff] }
  0xb2   : > { %1117 = vmatpush1.bf16.msra.mxu0 %v1116_v43  ;;  %v370_v43 = vld [vmem:[%s1806_s10 + $0x4d0] sm:$0xff]  ;;  %v661_v11 = vld [vmem:[%s1806_s10 + $0x5a8] sm:$0xff]  ;;  %v387_v20 = vld [vmem:[%s1806_s10 + $0x5d8] sm:$0xff] }
  0xb3   : > { %1245 = vmatpush1.bf16.msra.mxu1 %v1244_v44  ;;  %1119 = vmatprep.subr.bf16.mxu0 %v1118_v45  ;;  %v372_v44 = vld [vmem:[%s1806_s10 + $0x4f0] sm:$0xff]  ;;  %v646_v45 = vld [vmem:[%s1806_s10 + $0x4c0] sm:$0xff]  ;;  %v1278_v19 = vpack.c.bf16 %v661_v11, %v659_v10  ;;  %v389_v21 = vld [vmem:[%s1806_s10 + $0x5f8] sm:$0xff] }
  0xb4   : > { %1247 = vmatprep.subr.bf16.mxu1 %v1246_v49  ;;  %v377_v49 = vld [vmem:[%s1806_s10 + $0x538] sm:$0xff]  ;;  %v1140_v52 = vpack.c.bf16 %v372_v44, %v370_v43  ;;  %v1268_v53 = vpack.c.bf16 %v648_v47, %v646_v45  ;;  %v663_v23 = vld [vmem:[%s1806_s10 + $0x5c8] sm:$0xff]  ;;  %v1154_v27 = vpack.c.bf16 %v389_v21, %v387_v20  ;;  %v664_v32 = vld [vmem:[%s1806_s10 + $0x5e0] sm:$0xff] }
  0xb5   : > { %v1142_v54 = vpack.c.bf16 %v377_v49, %v375_v48  ;;  %v665_v24 = vld [vmem:[%s1806_s10 + $0x5e8] sm:$0xff]  ;;  %v391_v33 = vld [vmem:[%s1806_s10 + $0x618] sm:$0xff]  ;;  %v668_v44 = vld [vmem:[%s1806_s10 + $0x620] sm:$0xff] }
  0xb6   : > { %1121 = vmatpush1.bf16.msra.mxu0 %v1120_v55  ;;  %v374_v55 = vld [vmem:[%s1806_s10 + $0x510] sm:$0xff]  ;;  %v1282_v31 = vpack.c.bf16 %v665_v24, %v663_v23  ;;  %v667_v35 = vld [vmem:[%s1806_s10 + $0x608] sm:$0xff]  ;;  %v395_v45 = vld [vmem:[%s1806_s10 + $0x658] sm:$0xff] }
  0xb7   : > { %1249 = vmatpush1.bf16.msra.mxu1 %v1248_v56  ;;  %1123 = vmatprep.subr.bf16.mxu0 %v1122_v57  ;;  %v376_v56 = vld [vmem:[%s1806_s10 + $0x530] sm:$0xff]  ;;  %v650_v57 = vld [vmem:[%s1806_s10 + $0x500] sm:$0xff]  ;;  %v669_v36 = vld [vmem:[%s1806_s10 + $0x628] sm:$0xff] }
  0xb8   : > { %1251 = vmatprep.subr.bf16.mxu1 %v1250_v61  ;;  %v381_v61 = vld [vmem:[%s1806_s10 + $0x578] sm:$0xff]  ;;  %v1144_v0 = vpack.c.bf16 %v376_v56, %v374_v55  ;;  %v1272_v1 = vpack.c.bf16 %v652_v59, %v650_v57  ;;  %v1286_v43 = vpack.c.bf16 %v669_v36, %v667_v35  ;;  %v671_v47 = vld [vmem:[%s1806_s10 + $0x648] sm:$0xff]  ;;  %v672_v56 = vld [vmem:[%s1806_s10 + $0x660] sm:$0xff] }
  0xb9   : > { %v1146_v2 = vpack.c.bf16 %v381_v61, %v379_v60  ;;  %v673_v48 = vld [vmem:[%s1806_s10 + $0x668] sm:$0xff]  ;;  %v399_v57 = vld [vmem:[%s1806_s10 + $0x698] sm:$0xff]  ;;  %v406_v24 = vld [vmem:[%s1806_s10 + $0x710] sm:$0xff] }
  0xba   : > { %1125 = vmatpush1.bf16.msra.mxu0 %v1124_v3  ;;  %v378_v3 = vld [vmem:[%s1806_s10 + $0x550] sm:$0xff]  ;;  %v1290_v55 = vpack.c.bf16 %v673_v48, %v671_v47  ;;  %v675_v59 = vld [vmem:[%s1806_s10 + $0x688] sm:$0xff] }
  0xbb   : > { %1253 = vmatpush1.bf16.msra.mxu1 %v1252_v4  ;;  %1127 = vmatprep.subr.bf16.mxu0 %v1126_v5  ;;  %v380_v4 = vld [vmem:[%s1806_s10 + $0x570] sm:$0xff]  ;;  %v654_v5 = vld [vmem:[%s1806_s10 + $0x540] sm:$0xff]  ;;  %v677_v60 = vld [vmem:[%s1806_s10 + $0x6a8] sm:$0xff] }
  0xbc   : > { %1255 = vmatprep.subr.bf16.mxu1 %v1254_v9  ;;  %v385_v9 = vld [vmem:[%s1806_s10 + $0x5b8] sm:$0xff]  ;;  %v1148_v12 = vpack.c.bf16 %v380_v4, %v378_v3  ;;  %v1276_v14 = vpack.c.bf16 %v656_v7, %v654_v5  ;;  %v1294_v3 = vpack.c.bf16 %v677_v60, %v675_v59  ;;  %v676_v4 = vld [vmem:[%s1806_s10 + $0x6a0] sm:$0xff]  ;;  %v679_v7 = vld [vmem:[%s1806_s10 + $0x6c8] sm:$0xff] }
  0xbd   : > { %487 = vmatmul.mubr.f32.vlgmr.msra.gmra.mrb[0].mxu0 %v288_v15  ;;  %v403_v5 = vld [vmem:[%s1806_s10 + $0x6d8] sm:$0xff]  ;;  %v685_v20 = vld [vmem:[%s1806_s10 + $0x728] sm:$0xff]  ;;  %v410_v36 = vld [vmem:[%s1806_s10 + $0x750] sm:$0xff] }
  0xbe   : > { %1129 = vmatpush1.bf16.msra.mxu0 %v1128_v16  ;;  %763 = vmatmul.mubr.f32.vlgmr.msra.gmra.mrb[0].mxu1 %v288_v15  ;;  %v1150_v15 = vpack.c.bf16 %v385_v9, %v383_v8  ;;  %v384_v16 = vld [vmem:[%s1806_s10 + $0x5b0] sm:$0xff]  ;;  %v681_v8 = vld [vmem:[%s1806_s10 + $0x6e8] sm:$0xff] }
  0xbf   : > { %1257 = vmatpush1.bf16.msra.mxu1 %v1256_v17  ;;  %1131 = vmatprep.subr.bf16.mxu0 %v1130_v18  ;;  %v658_v17 = vld [vmem:[%s1806_s10 + $0x580] sm:$0xff]  ;;  %v1152_v25 = vpack.c.bf16 %v384_v16, %v382_v13  ;;  %v404_v13 = vld [vmem:[%s1806_s10 + $0x6f0] sm:$0xff] }
  0xc0   : > { %1259 = vmatprep.subr.bf16.mxu1 %v1258_v22  ;;  %v660_v18 = vld [vmem:[%s1806_s10 + $0x5a0] sm:$0xff]  ;;  %v291_v22 = vld [vmem:[#allocation4 + $0x18] sm:$0xff]  ;;  %v414_v48 = vld [vmem:[%s1806_s10 + $0x790] sm:$0xff] }
  0xc1   : > { %557 = vmatprep.mubr.f32.mxu0 %v291_v22  ;;  %833 = vmatprep.mubr.f32.mxu1 %v291_v22  ;;  %v1280_v26 = vpack.c.bf16 %v660_v18, %v658_v17  ;;  %v680_v16 = vld [vmem:[%s1806_s10 + $0x6e0] sm:$0xff]  ;;  %v407_v17 = vld [vmem:[%s1806_s10 + $0x718] sm:$0xff]  ;;  %v418_v60 = vld [vmem:[%s1806_s10 + $0x7d0] sm:$0xff] }
  0xc2   : > { %1133 = vmatpush1.bf16.msra.mxu0 %v1132_v28  ;;  %v386_v28 = vld [vmem:[%s1806_s10 + $0x5d0] sm:$0xff]  ;;  %v409_v18 = vld [vmem:[%s1806_s10 + $0x738] sm:$0xff] }
  0xc3   : > { %1261 = vmatpush1.bf16.msra.mxu1 %v1260_v29  ;;  %1135 = vmatprep.subr.bf16.mxu0 %v1134_v30  ;;  %v388_v29 = vld [vmem:[%s1806_s10 + $0x5f0] sm:$0xff]  ;;  %v662_v30 = vld [vmem:[%s1806_s10 + $0x5c0] sm:$0xff]  ;;  %v1174_v23 = vpack.c.bf16 %v409_v18, %v407_v17 }
  0xc4   : > { %1263 = vmatprep.subr.bf16.mxu1 %v1262_v34  ;;  %v393_v34 = vld [vmem:[%s1806_s10 + $0x638] sm:$0xff]  ;;  %v1156_v37 = vpack.c.bf16 %v388_v29, %v386_v28  ;;  %v1284_v38 = vpack.c.bf16 %v664_v32, %v662_v30  ;;  %v684_v28 = vld [vmem:[%s1806_s10 + $0x720] sm:$0xff]  ;;  %v689_v32 = vld [vmem:[%s1806_s10 + $0x768] sm:$0xff] }
  0xc5   : > { %v1158_v39 = vpack.c.bf16 %v393_v34, %v391_v33  ;;  %v411_v29 = vld [vmem:[%s1806_s10 + $0x758] sm:$0xff] }
  0xc6   : > { %1137 = vmatpush1.bf16.msra.mxu0 %v1136_v40  ;;  %v390_v40 = vld [vmem:[%s1806_s10 + $0x610] sm:$0xff]  ;;  %v413_v30 = vld [vmem:[%s1806_s10 + $0x778] sm:$0xff] }
  0xc7   : > { %1265 = vmatpush1.bf16.msra.mxu1 %v1264_v41  ;;  %1139 = vmatprep.subr.bf16.mxu0 %v1138_v42  ;;  %v392_v41 = vld [vmem:[%s1806_s10 + $0x630] sm:$0xff]  ;;  %v666_v42 = vld [vmem:[%s1806_s10 + $0x600] sm:$0xff]  ;;  %v1178_v35 = vpack.c.bf16 %v413_v30, %v411_v29 }
  0xc8   : > { %1267 = vmatprep.subr.bf16.mxu1 %v1266_v46  ;;  %v397_v46 = vld [vmem:[%s1806_s10 + $0x678] sm:$0xff]  ;;  %v1160_v49 = vpack.c.bf16 %v392_v41, %v390_v40  ;;  %v1288_v50 = vpack.c.bf16 %v668_v44, %v666_v42  ;;  %v688_v40 = vld [vmem:[%s1806_s10 + $0x760] sm:$0xff]  ;;  %v693_v44 = vld [vmem:[%s1806_s10 + $0x7a8] sm:$0xff] }
  0xc9   : > { %v1162_v51 = vpack.c.bf16 %v397_v46, %v395_v45  ;;  %v415_v41 = vld [vmem:[%s1806_s10 + $0x798] sm:$0xff] }
  0xca   : > { %1141 = vmatpush1.bf16.msra.mxu0 %v1140_v52  ;;  %v394_v52 = vld [vmem:[%s1806_s10 + $0x650] sm:$0xff]  ;;  %v417_v42 = vld [vmem:[%s1806_s10 + $0x7b8] sm:$0xff] }
  0xcb   : > { %1269 = vmatpush1.bf16.msra.mxu1 %v1268_v53  ;;  %1143 = vmatprep.subr.bf16.mxu0 %v1142_v54  ;;  %v396_v53 = vld [vmem:[%s1806_s10 + $0x670] sm:$0xff]  ;;  %v670_v54 = vld [vmem:[%s1806_s10 + $0x640] sm:$0xff]  ;;  %v1182_v47 = vpack.c.bf16 %v417_v42, %v415_v41 }
  0xcc   : > { %1271 = vmatprep.subr.bf16.mxu1 %v1270_v58  ;;  %v401_v58 = vld [vmem:[%s1806_s10 + $0x6b8] sm:$0xff]  ;;  %v1164_v61 = vpack.c.bf16 %v396_v53, %v394_v52  ;;  %v1292_v62 = vpack.c.bf16 %v672_v56, %v670_v54  ;;  %v692_v52 = vld [vmem:[%s1806_s10 + $0x7a0] sm:$0xff]  ;;  %v697_v56 = vld [vmem:[%s1806_s10 + $0x7e8] sm:$0xff] }
  0xcd   : > { %v1166_v63 = vpack.c.bf16 %v401_v58, %v399_v57  ;;  %v419_v53 = vld [vmem:[%s1806_s10 + $0x7d8] sm:$0xff] }
  0xce   : > { %1145 = vmatpush1.bf16.msra.mxu0 %v1144_v0  ;;  %v398_v0 = vld [vmem:[%s1806_s10 + $0x690] sm:$0xff]  ;;  %v421_v54 = vld [vmem:[%s1806_s10 + $0x7f8] sm:$0xff] }
  0xcf   : > { %1273 = vmatpush1.bf16.msra.mxu1 %v1272_v1  ;;  %1147 = vmatprep.subr.bf16.mxu0 %v1146_v2  ;;  %v400_v1 = vld [vmem:[%s1806_s10 + $0x6b0] sm:$0xff]  ;;  %v674_v2 = vld [vmem:[%s1806_s10 + $0x680] sm:$0xff]  ;;  %v1186_v59 = vpack.c.bf16 %v421_v54, %v419_v53 }
  0xd0   : > { %1275 = vmatprep.subr.bf16.mxu1 %v1274_v6  ;;  %v405_v6 = vld [vmem:[%s1806_s10 + $0x6f8] sm:$0xff]  ;;  %v1168_v9 = vpack.c.bf16 %v400_v1, %v398_v0  ;;  %v1296_v10 = vpack.c.bf16 %v676_v4, %v674_v2  ;;  %v696_v0 = vld [vmem:[%s1806_s10 + $0x7e0] sm:$0xff]  ;;  %v851_v4 = vlaneseq }
  0xd1   : > { %v1170_v11 = vpack.c.bf16 %v405_v6, %v403_v5 }
  0xd2   : > { %1149 = vmatpush1.bf16.msra.mxu0 %v1148_v12  ;;  %v402_v12 = vld [vmem:[%s1806_s10 + $0x6d0] sm:$0xff]  ;;  %v852_v5 = vshrl.u32 %v851_v4, 7 }
  0xd3   : > { %1277 = vmatpush1.bf16.msra.mxu1 %v1276_v14  ;;  %1151 = vmatprep.subr.bf16.mxu0 %v1150_v15  ;;  %v678_v14 = vld [vmem:[%s1806_s10 + $0x6c0] sm:$0xff]  ;;  %v1298_v15 = vpack.c.bf16 %v681_v8, %v679_v7  ;;  %v1172_v21 = vpack.c.bf16 %v404_v13, %v402_v12 }
  0xd4   : > { %1279 = vmatprep.subr.bf16.mxu1 %v1278_v19  ;;  %v683_v19 = vld [vmem:[%s1806_s10 + $0x708] sm:$0xff]  ;;  %v1300_v22 = vpack.c.bf16 %v680_v16, %v678_v14  ;;  %v853_v6 = vsub.s32 0, %v852_v5  ;;  %v849_v7 = vld [vmem:[%s247_s7 + $0x2] sm:$0x3]  ;;  %v857_v8 = vsub.s32 1, %v852_v5 }
  0xd6   : > { %1153 = vmatpush1.bf16.msra.mxu0 %v1152_v25  ;;  %v408_v25 = vld [vmem:[%s1806_s10 + $0x730] sm:$0xff] }
  0xd7   : > { %1281 = vmatpush1.bf16.msra.mxu1 %v1280_v26  ;;  %1155 = vmatprep.subr.bf16.mxu0 %v1154_v27  ;;  %v682_v26 = vld [vmem:[%s1806_s10 + $0x700] sm:$0xff]  ;;  %v1302_v27 = vpack.c.bf16 %v685_v20, %v683_v19  ;;  %v1176_v33 = vpack.c.bf16 %v408_v25, %v406_v24 }
  0xd8   : > { %1283 = vmatprep.subr.bf16.mxu1 %v1282_v31  ;;  %v687_v31 = vld [vmem:[%s1806_s10 + $0x748] sm:$0xff]  ;;  %v1304_v34 = vpack.c.bf16 %v684_v28, %v682_v26 }
  0xda   : > { %1157 = vmatpush1.bf16.msra.mxu0 %v1156_v37  ;;  %v412_v37 = vld [vmem:[%s1806_s10 + $0x770] sm:$0xff] }
  0xdb   : > { %1285 = vmatpush1.bf16.msra.mxu1 %v1284_v38  ;;  %1159 = vmatprep.subr.bf16.mxu0 %v1158_v39  ;;  %v686_v38 = vld [vmem:[%s1806_s10 + $0x740] sm:$0xff]  ;;  %v1306_v39 = vpack.c.bf16 %v689_v32, %v687_v31  ;;  %v1180_v45 = vpack.c.bf16 %v412_v37, %v410_v36 }
  0xdc   : > { %1287 = vmatprep.subr.bf16.mxu1 %v1286_v43  ;;  %v691_v43 = vld [vmem:[%s1806_s10 + $0x788] sm:$0xff]  ;;  %v1308_v46 = vpack.c.bf16 %v688_v40, %v686_v38 }
  0xde   : > { %1161 = vmatpush1.bf16.msra.mxu0 %v1160_v49  ;;  %v416_v49 = vld [vmem:[%s1806_s10 + $0x7b0] sm:$0xff] }
  0xdf   : > { %1289 = vmatpush1.bf16.msra.mxu1 %v1288_v50  ;;  %1163 = vmatprep.subr.bf16.mxu0 %v1162_v51  ;;  %v690_v50 = vld [vmem:[%s1806_s10 + $0x780] sm:$0xff]  ;;  %v1310_v51 = vpack.c.bf16 %v693_v44, %v691_v43  ;;  %v1184_v57 = vpack.c.bf16 %v416_v49, %v414_v48 }
  0xe0   : > { %1291 = vmatprep.subr.bf16.mxu1 %v1290_v55  ;;  %v695_v55 = vld [vmem:[%s1806_s10 + $0x7c8] sm:$0xff]  ;;  %v1312_v58 = vpack.c.bf16 %v692_v52, %v690_v50 }
  0xe2   : > { %1165 = vmatpush1.bf16.msra.mxu0 %v1164_v61  ;;  %v420_v61 = vld [vmem:[%s1806_s10 + $0x7f0] sm:$0xff] }
  0xe3   : > { %1293 = vmatpush1.bf16.msra.mxu1 %v1292_v62  ;;  %1167 = vmatprep.subr.bf16.mxu0 %v1166_v63  ;;  %v1314_v62 = vpack.c.bf16 %v697_v56, %v695_v55  ;;  %v694_v63 = vld [vmem:[%s1806_s10 + $0x7c0] sm:$0xff]  ;;  %v1188_v1 = vpack.c.bf16 %v420_v61, %v418_v60 }
  0xe4   : > { %1295 = vmatprep.subr.bf16.mxu1 %v1294_v3  ;;  %v1316_v2 = vpack.c.bf16 %v696_v0, %v694_v63  ;;  %v290_v3 = vld [vmem:[#allocation4 + $0x10] sm:$0xff] }
  0xe6   : > { %1169 = vmatpush1.bf16.msra.mxu0 %v1168_v9  ;;  %v854_v9 = vrot.slane %v849_v7, %v853_v6 }
  0xe7   : > { %1297 = vmatpush1.bf16.msra.mxu1 %v1296_v10  ;;  %1171 = vmatprep.subr.bf16.mxu0 %v1170_v11  ;;  %v858_v10 = vrot.slane %v849_v7, %v857_v8 }
  0xe8   : > { %1299 = vmatprep.subr.bf16.mxu1 %v1298_v15 }
  0xea   : > { %1173 = vmatpush1.bf16.msra.mxu0 %v1172_v21 }
  0xeb   : > { %1301 = vmatpush1.bf16.msra.mxu1 %v1300_v22  ;;  %1175 = vmatprep.subr.bf16.mxu0 %v1174_v23  ;;  %v877_v23 = vld [vmem:[%s247_s7] sm:$0x3] }
  0xec   : > { %1303 = vmatprep.subr.bf16.mxu1 %v1302_v27  ;;  %v882_v24 = vrot.slane %v877_v23, %v853_v6  ;;  %v886_v25 = vrot.slane %v877_v23, %v857_v8 }
  0xee   : > { %1177 = vmatpush1.bf16.msra.mxu0 %v1176_v33 }
  0xef   : > { %1305 = vmatpush1.bf16.msra.mxu1 %v1304_v34  ;;  %1179 = vmatprep.subr.bf16.mxu0 %v1178_v35 }
  0xf0   : > { %1307 = vmatprep.subr.bf16.mxu1 %v1306_v39 }
  0xf2   : > { %1181 = vmatpush1.bf16.msra.mxu0 %v1180_v45 }
  0xf3   : > { %1309 = vmatpush1.bf16.msra.mxu1 %v1308_v46  ;;  %1183 = vmatprep.subr.bf16.mxu0 %v1182_v47 }
  0xf4   : > { %1311 = vmatprep.subr.bf16.mxu1 %v1310_v51 }
  0xf6   : > { %1185 = vmatpush1.bf16.msra.mxu0 %v1184_v57 }
  0xf7   : > { %1313 = vmatpush1.bf16.msra.mxu1 %v1312_v58  ;;  %1187 = vmatprep.subr.bf16.mxu0 %v1186_v59 }
  0xf8   : > { %1315 = vmatprep.subr.bf16.mxu1 %v1314_v62 }
  0xfa   : > { %1189 = vmatpush1.bf16.msra.mxu0 %v1188_v1 }
  0xfb   : > { %1317 = vmatpush1.bf16.msra.mxu1 %v1316_v2 }
  0xfd   : > { %558 = vmatmul.mubr.f32.vlgmr.msra.gmra.mrb[0].mxu0 %v290_v3 }
  0xfe   : > { %834 = vmatmul.mubr.f32.vlgmr.msra.gmra.mrb[0].mxu1 %v290_v3 }
 0x1d0   : > { %v559_v11 = vpop.f32.mrb[0].mxu0 }
 0x1d1   : > { %v861_v12 = vadd.f32 %v854_v9, %v559_v11  ;;  %v835_v13 = vpop.f32.mrb[0].mxu1  ;;  %v561_v14 = vpop.f32.mrb[1].mxu0 }
 0x1d2   : > { %v862_v15 = vadd.f32 %v858_v10, %v561_v14  ;;  %v837_v16 = vpop.f32.mrb[1].mxu1  ;;  %v889_v26 = vadd.f32 %v882_v24, %v835_v13 }
 0x1d3   : > { %v1052_v17 = vmul.f32 -1.442695, %v861_v12  ;;  %v890_v28 = vadd.f32 %v886_v25, %v837_v16 }
 0x1d4   : > { %v1053_v18 = vmul.f32 -1.442695, %v862_v15 }
 0x1d5   : > { %1403 = vpow2.f32 %v1052_v17 }
 0x1d6   : > { %1405 = vpow2.f32 %v1053_v18 }
 0x1df   : > { %v1404_v19 = vpop.eup %1403 }
 0x1e0   : > { %v1406_v20 = vpop.eup %1405  ;;  %v869_v21 = vadd.f32 1.0, %v1404_v19 }
 0x1e1   : > { %v870_v22 = vadd.f32 1.0, %v1406_v20 }
 0x1e2   : > { %1407 = vrcp.f32 %v869_v21 }
 0x1e3   : > { %1409 = vrcp.f32 %v870_v22 }
 0x1ec   : > { %v1408_v27 = vpop.eup %1407 }
 0x1ed   : > { %v1410_v29 = vpop.eup %1409  ;;  %v891_v30 = vmul.f32 %v1408_v27, %v889_v26 }
 0x1ee   : > { %v892_v31 = vmul.f32 %v1410_v29, %v890_v28 }
 0x1ef   : > { %893 = vst [vmem:[%s274_s27] sm:$0xff] %v891_v30 }
 0x1f0   : > { %894 = vst [vmem:[%s274_s27 + $0x8] sm:$0xff] %v892_v31 }
 0x1f1   : > { %1512 = shalt.err (!%p1509_p2)
}
 0x1f2   : > { %s1513_s23 = scalar_lea.hbm %s2074_s8, 256  ;;  %s1517_s6 = scalar_lea.hbm %s2126_s3, 512 }
 0x1f3   : > { %p1514_p6 = scmp.ne.s32.totalorder %s2074_s8, %s1513_s23  ;;  %p1518_p8 = scmp.lt.u32.totalorder %s2074_s8, %s2126_s3 }
 0x1f4   : > { %p1519_p5 = scmp.lt.u32.totalorder %s1517_s6, %s1513_s23  ;;  %p1521_p10 = scmp.lt.u32.totalorder %s1513_s23, %s2074_s8 }
 0x1f5   : > { %p1515_p12 = pnand %p1514_p6, %p2145_p13 }
 0x1f6   : > { %p1520_p11 = por %p1519_p5, %p1518_p8 }
 0x1f7   : > { %p1516_p9 = pneg %p1515_p12 }
 0x1f8   : > { %p1522_p0 = por %p1521_p10, %p1520_p11 }
 0x1fa   : > { %p1523_p7 = pnand %p1522_p0, %p1516_p9 }
 0x1fc   : > { %1526 = shalt.err (!%p1523_p7)
}
 0x1fd   : > { %1330 = dma.vmem_to_hbm [thread:$0]  (%p2145_p13), %s2076_s19, 256, %s2074_s8, %s896_s15  }
 0x1fe PF: > { %s924_s7 = sand.u32 1, %s1565_s12   ;;  %p2146_p4 = scmp.ne.s32.totalorder %s2137_s4, 0 }
 0x1ff   : > { %p2147_p1 = scmp.ge.s32.totalorder %s1585_s17, 2  ;;  %s925_s9 = scalar_lea.sflag [#allocation6], %s924_s7 }
 0x201   : > { %p1344_p3 = pnand %p2147_p1, %p2146_p4 }
 0x203   : > { %1560 = dma.done.wait (!%p1344_p3), %s925_s9, 256  }
 0x204   : > { %1562 = vsyncadd (!%p1344_p3), %s925_s9, 4294967040  ;;  %s20_s17 = sadd.s32 1, %s1585_s17   ;;  %s2148_s12 = smov %s1569_s13 }
 0x205   : > { %p17_p2 = scmp.ge.s32.totalorder %s20_s17, 4   ;;  %s2149_s13 = smov %s1573_s14 }
 0x206   : > { %s2150_s14 = smov %s1662_s24  ;;  %s2151_s15 = smov %s1581_s16 }
 0x207   : > { %s2152_s16 = smov %s2154_s18  ;;  %19 = sbr.rel (!%p17_p2) target bundleno = 9 (0x9), region = 102 }
 0x20e   :  { %930 = vsyncpa [#allocation5], 1 }
 0x20f   :  { %932 = vsyncpa [#allocation5 + $0x1], 1 }
 0x210   :  { %933 = vsyncpa [#allocation8], 1 }
 0x211   :  { %935 = vsyncpa [#allocation8 + $0x1], 1 }
 0x212   :  { %936 = vsyncpa [#allocation6], 1 }
 0x213   :  { %938 = vsyncpa [#allocation6 + $0x1], 1 }

</bundles_post_ra>
